<compile_context>
chip_gen: v7x
topology: tpu7x:2x2x1
jax: 0.10.0
libtpu: 0.0.40
codegen_flags: <defaults>
</compile_context>

<pallas_src>
import functools

import jax
import jax.numpy as jnp
from jax.experimental import pallas as pl
from jax.experimental.pallas import tpu as pltpu

LANE = 128
SUBLANE = 8
H1, H2, HH = 256, 128, 128  # trunk widths and fused (adv|val) hidden width


def _round_up(x, m):
    return (x + m - 1) // m * m


def dueling_dqn_kernel(
    x_ref,
    w1_ref, b1_ref,
    w2_ref, b2_ref,
    wh1_ref, bh1_ref,
    wh2_ref, bh2_ref,
    out_ref,
    *, compute_dtype,
):
    """Straight chain of 4 MXU matmuls + VPU ReLUs on one batch tile."""

    def matmul(act, w_ref):
        # activations cast to compute_dtype only to feed the MXU; accumulate in f32.
        return jnp.dot(act.astype(compute_dtype), w_ref[...],
                       preferred_element_type=jnp.float32)

    x = x_ref[...]                                                   # [T, n_in_pad] f32
    h = jnp.maximum(matmul(x, w1_ref) + b1_ref[...], 0.0)            # [T, 256]
    h = jnp.maximum(matmul(h, w2_ref) + b2_ref[...], 0.0)            # [T, 128]
    h = jnp.maximum(matmul(h, wh1_ref) + bh1_ref[...], 0.0)          # [T, 128]  (a1|v1 fused)
    out_ref[...] = matmul(h, wh2_ref) + bh2_ref[...]                 # [T, 128]  lane-dense q


def prepare_params(params, n_actions, compute_dtype=jnp.float32):
    """Fold heads + dueling mean into a 4-layer dense chain; pad to lane-dense shapes.

    Run once per parameter set (host/XLA side); weights are then reused across calls.
    """
    f32 = jnp.float32
    n = n_actions
    n_in = params["w1"].shape[0]
    n_in_pad = _round_up(n_in, LANE)
    n_out_pad = _round_up(n, LANE)

    # Fused advantage|value first layer: [128,64]|[128,64] -> [128,128].
    wh1 = jnp.concatenate([params["wa1"], params["wv1"]], axis=1)
    bh1 = jnp.concatenate([params["ba1"], params["bv1"]], axis=1)

    # Fold the dueling aggregation into the fused second layer:
    #   q = a1 @ (wa2 @ (I - J/n)) + v1 @ (wv2 @ 1(1,n)) + (ba2 @ (I - J/n) + bv2)
    M = jnp.eye(n, dtype=f32) - jnp.full((n, n), 1.0 / n, f32)
    wh2 = jnp.concatenate(
        [params["wa2"].astype(f32) @ M,
         params["wv2"].astype(f32) @ jnp.ones((1, n), f32)], axis=0)   # [128, n]
    bh2 = params["ba2"].astype(f32) @ M + params["bv2"].astype(f32)    # [1, n]

    # Pad final output lanes to 128 (lane-dense stores), slice back in the wrapper.
    wh2 = jnp.pad(wh2, ((0, 0), (0, n_out_pad - n)))
    bh2 = jnp.pad(bh2, ((0, 0), (0, n_out_pad - n)))

    # Zero-pad the first-layer contraction dim to 128 lanes (one-time, host side).
    w1 = jnp.pad(params["w1"], ((0, n_in_pad - n_in), (0, 0)))

    weights = tuple(w.astype(compute_dtype) for w in (w1, params["w2"], wh1, wh2))
    biases = tuple(b.astype(f32) for b in (params["b1"], params["b2"], bh1, bh2))
    meta = dict(n_in=n_in, n_in_pad=n_in_pad, n_actions=n, n_out_pad=n_out_pad)
    return weights, biases, meta


def dueling_dqn_forward(state, weights, biases, meta, *, block_batch=512,
                        compute_dtype=jnp.float32):
    """state: [B, n_inputs] f32. Returns q-values [B, n_actions] f32."""
    w1, w2, wh1, wh2 = weights
    b1, b2, bh1, bh2 = biases
    n_in, n_in_pad = meta["n_in"], meta["n_in_pad"]
    n_actions, n_out_pad = meta["n_actions"], meta["n_out_pad"]

    B = state.shape[0]
    tile = min(block_batch, _round_up(B, SUBLANE))
    B_pad = _round_up(B, tile)
    grid = (B_pad // tile,)

    # Pad batch to a tile multiple and input features to 128 lanes (zeros).
    x = jnp.pad(state.astype(jnp.float32),
                ((0, B_pad - B), (0, n_in_pad - n_in)))

    # Batch-tiled activations; weights/biases resident across all grid steps.
    x_spec = pl.BlockSpec((tile, n_in_pad), lambda i: (i, 0))
    out_spec = pl.BlockSpec((tile, n_out_pad), lambda i: (i, 0))

    def resident(arr):
        return pl.BlockSpec(arr.shape, lambda i: (0, 0))

    flops = 2 * B_pad * (n_in_pad * H1 + H1 * H2 + H2 * HH + HH * n_out_pad)
    bytes_weights = sum(int(a.size) * a.dtype.itemsize for a in weights + biases)
    bytes_io = B_pad * (n_in_pad + n_out_pad) * 4
    cost = pl.CostEstimate(flops=flops, transcendentals=0,
                           bytes_accessed=bytes_weights + bytes_io)

    kernel = functools.partial(dueling_dqn_kernel, compute_dtype=compute_dtype)
    q_pad = pl.pallas_call(
        kernel,
        out_shape=jax.ShapeDtypeStruct((B_pad, n_out_pad), jnp.float32),
        grid=grid,
        in_specs=[
            x_spec,
            resident(w1), resident(b1),
            resident(w2), resident(b2),
            resident(wh1), resident(bh1),
            resident(wh2), resident(bh2),
        ],
        out_specs=out_spec,
        compiler_params=pltpu.CompilerParams(
            dimension_semantics=("parallel",)),
        cost_estimate=cost,
    )(x, w1, b1, w2, b2, wh1, bh1, wh2, bh2)

    return q_pad[:B, :n_actions]


def init_params(key, n_inputs, n_actions):
    """Deterministic synthetic init (uniform, torch-Linear-like fan_in scaling)."""
    def linear(k, fan_in, fan_out):
        kw, kb = jax.random.split(k)
        bound = 1.0 / jnp.sqrt(fan_in)
        w = jax.random.uniform(kw, (fan_in, fan_out), jnp.float32, -bound, bound)
        b = jax.random.uniform(kb, (1, fan_out), jnp.float32, -bound, bound)
        return w, b

    keys = jax.random.split(key, 6)
    p = {}
    p["w1"], p["b1"] = linear(keys[0], n_inputs, 256)
    p["w2"], p["b2"] = linear(keys[1], 256, 128)
    p["wa1"], p["ba1"] = linear(keys[2], 128, 64)
    p["wa2"], p["ba2"] = linear(keys[3], 64, n_actions)
    p["wv1"], p["bv1"] = linear(keys[4], 128, 64)
    p["wv2"], p["bv2"] = linear(keys[5], 64, 1)
    return p


def reference_forward(state, p):
    relu = lambda z: jnp.maximum(z, 0.0)
    h = relu(state @ p["w1"] + p["b1"])
    h = relu(h @ p["w2"] + p["b2"])
    adv = relu(h @ p["wa1"] + p["ba1"]) @ p["wa2"] + p["ba2"]
    val = relu(h @ p["wv1"] + p["bv1"]) @ p["wv2"] + p["bv2"]
    return val + (adv - adv.mean(axis=1, keepdims=True))


if __name__ == "__main__":
    # Small env-like shapes: observation dim 8, 4 discrete actions (e.g. LunarLander).
    batch, n_inputs, n_actions = 2, 8, 4

    key = jax.random.PRNGKey(0)
    k_params, k_state = jax.random.split(key)
    params = init_params(k_params, n_inputs, n_actions)
    state = jax.random.normal(k_state, (batch, n_inputs), jnp.float32)

    q_ref = jax.block_until_ready(reference_forward(state, params))

    # f32 path (exact match to the reference within fp rounding).
    weights, biases, meta = prepare_params(params, n_actions, jnp.float32)
    q_kernel = jax.block_until_ready(dueling_dqn_forward(state, weights, biases, meta))
    assert q_kernel.shape == (batch, n_actions)
    assert jnp.allclose(q_kernel, q_ref, atol=1e-4, rtol=1e-4), (q_kernel, q_ref)

    # bf16-weight / bf16-MXU path (v6e/v7x recommendation): f32 accumulation,
    # f32 bias/ReLU, so error stays small; looser tolerance for bf16 rounding.
    w_bf16, b_bf16, meta_bf16 = prepare_params(params, n_actions, jnp.bfloat16)
    q_bf16 = jax.block_until_ready(
        dueling_dqn_forward(state, w_bf16, b_bf16, meta_bf16,
                            compute_dtype=jnp.bfloat16))
    assert jnp.allclose(q_bf16, q_ref, atol=5e-2, rtol=5e-2), (q_bf16, q_ref)

    print("KERNEL_OK")
</pallas_src>

<mosaic_0001>
module attributes {stable_mosaic.version = 11 : i64} {
  func.func @dueling_dqn_kernel(%arg0: i32, %arg1: memref<8x128xf32, #tpu.memory_space<vmem>>, %arg2: memref<128x256xf32, #tpu.memory_space<vmem>>, %arg3: memref<1x256xf32, #tpu.memory_space<vmem>>, %arg4: memref<256x128xf32, #tpu.memory_space<vmem>>, %arg5: memref<1x128xf32, #tpu.memory_space<vmem>>, %arg6: memref<128x128xf32, #tpu.memory_space<vmem>>, %arg7: memref<1x128xf32, #tpu.memory_space<vmem>>, %arg8: memref<128x128xf32, #tpu.memory_space<vmem>>, %arg9: memref<1x128xf32, #tpu.memory_space<vmem>>, %arg10: memref<8x128xf32, #tpu.memory_space<vmem>>) attributes {dimension_semantics = [#tpu.dimension_semantics<parallel>], iteration_bounds = array<i64: 1>, scalar_prefetch = 0 : i64, scratch_operands = 0 : i64, tpu.core_type = #tpu.core_type<tc>, window_params = [{transform_indices = @transform_0, window_bounds = array<i64: 8, 128>}, {pipeline_mode = #tpu.pipeline_mode<synchronous>, transform_indices = @transform_1, window_bounds = array<i64: 128, 256>}, {pipeline_mode = #tpu.pipeline_mode<synchronous>, transform_indices = @transform_2, window_bounds = array<i64: 1, 256>}, {pipeline_mode = #tpu.pipeline_mode<synchronous>, transform_indices = @transform_3, window_bounds = array<i64: 256, 128>}, {pipeline_mode = #tpu.pipeline_mode<synchronous>, transform_indices = @transform_4, window_bounds = array<i64: 1, 128>}, {pipeline_mode = #tpu.pipeline_mode<synchronous>, transform_indices = @transform_5, window_bounds = array<i64: 128, 128>}, {pipeline_mode = #tpu.pipeline_mode<synchronous>, transform_indices = @transform_6, window_bounds = array<i64: 1, 128>}, {pipeline_mode = #tpu.pipeline_mode<synchronous>, transform_indices = @transform_7, window_bounds = array<i64: 128, 128>}, {pipeline_mode = #tpu.pipeline_mode<synchronous>, transform_indices = @transform_8, window_bounds = array<i64: 1, 128>}, {transform_indices = @transform_9, window_bounds = array<i64: 8, 128>}]} {
    %c0 = arith.constant 0 : index
    %c0_0 = arith.constant 0 : index
    %0 = vector.load %arg1[%c0, %c0_0] : memref<8x128xf32, #tpu.memory_space<vmem>>, vector<8x128xf32>
    %c0_1 = arith.constant 0 : index
    %c0_2 = arith.constant 0 : index
    %1 = vector.load %arg2[%c0_1, %c0_2] : memref<128x256xf32, #tpu.memory_space<vmem>>, vector<128x256xf32>
    %cst = arith.constant dense<0.000000e+00> : vector<8x256xf32>
    %2 = tpu.matmul %0, %1, %cst {dimension_numbers = #tpu.dot_dimension_numbers<[1], [0], [0], [1], [0, 0, 1, 1], [], []>} : vector<8x128xf32>, vector<128x256xf32>, vector<8x256xf32> -> vector<8x256xf32>
    %c0_3 = arith.constant 0 : index
    %c0_4 = arith.constant 0 : index
    %3 = vector.load %arg3[%c0_3, %c0_4] : memref<1x256xf32, #tpu.memory_space<vmem>>, vector<1x256xf32>
    %4 = vector.broadcast %3 : vector<1x256xf32> to vector<8x256xf32>
    %5 = arith.addf %2, %4 : vector<8x256xf32>
    %cst_5 = arith.constant 0.000000e+00 : f32
    %6 = vector.broadcast %cst_5 : f32 to vector<8x256xf32>
    %7 = arith.maximumf %5, %6 : vector<8x256xf32>
    %c0_6 = arith.constant 0 : index
    %c0_7 = arith.constant 0 : index
    %8 = vector.load %arg4[%c0_6, %c0_7] : memref<256x128xf32, #tpu.memory_space<vmem>>, vector<256x128xf32>
    %cst_8 = arith.constant dense<0.000000e+00> : vector<8x128xf32>
    %9 = tpu.matmul %7, %8, %cst_8 {dimension_numbers = #tpu.dot_dimension_numbers<[1], [0], [0], [1], [0, 0, 1, 1], [], []>} : vector<8x256xf32>, vector<256x128xf32>, vector<8x128xf32> -> vector<8x128xf32>
    %c0_9 = arith.constant 0 : index
    %c0_10 = arith.constant 0 : index
    %10 = vector.load %arg5[%c0_9, %c0_10] : memref<1x128xf32, #tpu.memory_space<vmem>>, vector<1x128xf32>
    %11 = vector.broadcast %10 : vector<1x128xf32> to vector<8x128xf32>
    %12 = arith.addf %9, %11 : vector<8x128xf32>
    %cst_11 = arith.constant 0.000000e+00 : f32
    %13 = vector.broadcast %cst_11 : f32 to vector<8x128xf32>
    %14 = arith.maximumf %12, %13 : vector<8x128xf32>
    %c0_12 = arith.constant 0 : index
    %c0_13 = arith.constant 0 : index
    %15 = vector.load %arg6[%c0_12, %c0_13] : memref<128x128xf32, #tpu.memory_space<vmem>>, vector<128x128xf32>
    %cst_14 = arith.constant dense<0.000000e+00> : vector<8x128xf32>
    %16 = tpu.matmul %14, %15, %cst_14 {dimension_numbers = #tpu.dot_dimension_numbers<[1], [0], [0], [1], [0, 0, 1, 1], [], []>} : vector<8x128xf32>, vector<128x128xf32>, vector<8x128xf32> -> vector<8x128xf32>
    %c0_15 = arith.constant 0 : index
    %c0_16 = arith.constant 0 : index
    %17 = vector.load %arg7[%c0_15, %c0_16] : memref<1x128xf32, #tpu.memory_space<vmem>>, vector<1x128xf32>
    %18 = vector.broadcast %17 : vector<1x128xf32> to vector<8x128xf32>
    %19 = arith.addf %16, %18 : vector<8x128xf32>
    %cst_17 = arith.constant 0.000000e+00 : f32
    %20 = vector.broadcast %cst_17 : f32 to vector<8x128xf32>
    %21 = arith.maximumf %19, %20 : vector<8x128xf32>
    %c0_18 = arith.constant 0 : index
    %c0_19 = arith.constant 0 : index
    %22 = vector.load %arg8[%c0_18, %c0_19] : memref<128x128xf32, #tpu.memory_space<vmem>>, vector<128x128xf32>
    %cst_20 = arith.constant dense<0.000000e+00> : vector<8x128xf32>
    %23 = tpu.matmul %21, %22, %cst_20 {dimension_numbers = #tpu.dot_dimension_numbers<[1], [0], [0], [1], [0, 0, 1, 1], [], []>} : vector<8x128xf32>, vector<128x128xf32>, vector<8x128xf32> -> vector<8x128xf32>
    %c0_21 = arith.constant 0 : index
    %c0_22 = arith.constant 0 : index
    %24 = vector.load %arg9[%c0_21, %c0_22] : memref<1x128xf32, #tpu.memory_space<vmem>>, vector<1x128xf32>
    %25 = vector.broadcast %24 : vector<1x128xf32> to vector<8x128xf32>
    %26 = arith.addf %23, %25 : vector<8x128xf32>
    %c0_23 = arith.constant 0 : index
    %c0_24 = arith.constant 0 : index
    %27 = vector.load %arg10[%c0_23, %c0_24] : memref<8x128xf32, #tpu.memory_space<vmem>>, vector<8x128xf32>
    tpu.vector_store %arg10[%c0_23, %c0_24], %26 {strides = array<i32>} : memref<8x128xf32, #tpu.memory_space<vmem>>, vector<8x128xf32>,
    return
  }
  func.func @transform_0(%arg0: i32) -> (i32, i32) {
    %c0_i32 = arith.constant 0 : i32
    %c0_i32_0 = arith.constant 0 : i32
    return %arg0, %c0_i32 : i32, i32
  }
  func.func @transform_1(%arg0: i32) -> (i32, i32) {
    %c0_i32 = arith.constant 0 : i32
    %c0_i32_0 = arith.constant 0 : i32
    %c0_i32_1 = arith.constant 0 : i32
    return %c0_i32, %c0_i32_0 : i32, i32
  }
  func.func @transform_2(%arg0: i32) -> (i32, i32) {
    %c0_i32 = arith.constant 0 : i32
    %c0_i32_0 = arith.constant 0 : i32
    %c0_i32_1 = arith.constant 0 : i32
    return %c0_i32, %c0_i32_0 : i32, i32
  }
  func.func @transform_3(%arg0: i32) -> (i32, i32) {
    %c0_i32 = arith.constant 0 : i32
    %c0_i32_0 = arith.constant 0 : i32
    %c0_i32_1 = arith.constant 0 : i32
    return %c0_i32, %c0_i32_0 : i32, i32
  }
  func.func @transform_4(%arg0: i32) -> (i32, i32) {
    %c0_i32 = arith.constant 0 : i32
    %c0_i32_0 = arith.constant 0 : i32
    %c0_i32_1 = arith.constant 0 : i32
    return %c0_i32, %c0_i32_0 : i32, i32
  }
  func.func @transform_5(%arg0: i32) -> (i32, i32) {
    %c0_i32 = arith.constant 0 : i32
    %c0_i32_0 = arith.constant 0 : i32
    %c0_i32_1 = arith.constant 0 : i32
    return %c0_i32, %c0_i32_0 : i32, i32
  }
  func.func @transform_6(%arg0: i32) -> (i32, i32) {
    %c0_i32 = arith.constant 0 : i32
    %c0_i32_0 = arith.constant 0 : i32
    %c0_i32_1 = arith.constant 0 : i32
    return %c0_i32, %c0_i32_0 : i32, i32
  }
  func.func @transform_7(%arg0: i32) -> (i32, i32) {
    %c0_i32 = arith.constant 0 : i32
    %c0_i32_0 = arith.constant 0 : i32
    %c0_i32_1 = arith.constant 0 : i32
    return %c0_i32, %c0_i32_0 : i32, i32
  }
  func.func @transform_8(%arg0: i32) -> (i32, i32) {
    %c0_i32 = arith.constant 0 : i32
    %c0_i32_0 = arith.constant 0 : i32
    %c0_i32_1 = arith.constant 0 : i32
    return %c0_i32, %c0_i32_0 : i32, i32
  }
  func.func @transform_9(%arg0: i32) -> (i32, i32) {
    %c0_i32 = arith.constant 0 : i32
    %c0_i32_0 = arith.constant 0 : i32
    return %arg0, %c0_i32 : i32, i32
  }
}

</mosaic_0001>

<bundles_post_ra>
// kernel: tpu_custom_call.1
= control target key start
LH: loop header
LB: loop body
LE: loop exit
PB: predicated region body
PF: predicated region fallthrough
CT: control target
= control target key end

     0   :  { %14 = vsyncpa [#allocation3], 0  ;;  %s1114_s0 = inlined_call_operand.hbm [shape: f32[8,128], index: 0, kind: input, shape index: {}]   ;;  %s1115_s1 = inlined_call_operand.hbm [shape: f32[128,256], index: 1, kind: input, shape index: {}]   ;;  %s1116_s2 = inlined_call_operand.vmem [shape: f32[1,256], index: 2, kind: input, shape index: {}]   ;;  %s1117_s3 = inlined_call_operand.hbm [shape: f32[256,128], index: 3, kind: input, shape index: {}]   ;;  %s1118_s4 = inlined_call_operand.vmem [shape: f32[1,128], index: 4, kind: input, shape index: {}]   ;;  %s1119_s5 = inlined_call_operand.hbm [shape: f32[128,128], index: 5, kind: input, shape index: {}]   ;;  %s1120_s6 = inlined_call_operand.vmem [shape: f32[1,128], index: 6, kind: input, shape index: {}]   ;;  %s1121_s7 = inlined_call_operand.hbm [shape: f32[128,128], index: 7, kind: input, shape index: {}]   ;;  %s1122_s8 = inlined_call_operand.vmem [shape: f32[1,128], index: 8, kind: input, shape index: {}]   ;;  %s1123_s9 = inlined_call_operand.hbm [shape: f32[8,128], index: 9, kind: output, shape index: {}]  }
   0x1   :  { %15 = vsyncpa [#allocation6], 0 }
   0x2   :  { %16 = vsyncpa [#allocation9], 0 }
   0x3   :  { %17 = vsyncpa [#allocation4], 0  ;;  %s939_s30 = smov [#allocation5]   ;;  %s799_s13 = scalar_lea.hbm %s1115_s1, 4096 }
   0x4   :  { %s33_s10 = sshll.u32 %s939_s30, 4  ;;  %p800_p0 = scmp.ne.s32.totalorder %s1115_s1, %s799_s13  ;;  %s34_s10 = int_to_ptr.vmem [resolvable:$true] %s33_s10 }
   0x5   :  { %p803_p1 = scmp.lt.u32.totalorder %s799_s13, %s1115_s1 }
   0x7   :  { %p805_p2 = pnand %p803_p1, %p800_p0 }
   0x9   :  { %808 = shalt.err (!%p805_p2)
}
   0xa   :  { %s809_s18 = scalar_lea.vmem %s34_s10, 4096  ;;  %p814_p4 = scmp.lt.s32.totalorder %s34_s10, %s34_s10 }
   0xb   :  { %p810_p3 = scmp.ne.s32.totalorder %s34_s10, %s809_s18  ;;  %p815_p5 = scmp.lt.s32.totalorder %s809_s18, %s809_s18 }
   0xd   :  { %p816_p6 = por %p815_p5, %p814_p4 }
   0xf   :  { %p817_p7 = pnand %p816_p6, %p810_p3 }
  0x11   :  { %820 = shalt.err (!%p817_p7)
}
  0x12   :  { %s940_s19 = smov 256   ;;  %s941_s20 = smov 16  }
  0x13   :  { %39 = dma.hbm_to_vmem [thread:$0]  %s1115_s1, 4096, %s34_s10, [#allocation6], %s940_s19, %s940_s19, %s941_s20  }
  0x14   :  { %s942_s23 = smov [#allocation8]   ;;  %s943_s25 = smov [#allocation2]  }
  0x15   :  { %s61_s24 = sshll.u32 %s942_s23, 4  ;;  %s24_s26 = sshll.u32 %s943_s25, 4  ;;  %s62_s24 = int_to_ptr.vmem [resolvable:$true] %s61_s24  ;;  %s25_s26 = int_to_ptr.vmem [resolvable:$true] %s24_s26 }
  0x16   :  { %s821_s29 = scalar_lea.hbm %s1119_s5, 2048 }
  0x17   :  { %p822_p8 = scmp.ne.s32.totalorder %s1119_s5, %s821_s29  ;;  %p825_p9 = scmp.lt.u32.totalorder %s821_s29, %s1119_s5 }
  0x19   :  { %p827_p10 = pnand %p825_p9, %p822_p8 }
  0x1b   :  { %830 = shalt.err (!%p827_p10)
}
  0x1c   :  { %s831_s1 = scalar_lea.vmem %s62_s24, 2048  ;;  %p836_p12 = scmp.lt.s32.totalorder %s62_s24, %s62_s24 }
  0x1d   :  { %p832_p11 = scmp.ne.s32.totalorder %s62_s24, %s831_s1  ;;  %p837_p13 = scmp.lt.s32.totalorder %s831_s1, %s831_s1 }
  0x1f   :  { %p838_p0 = por %p837_p13, %p836_p12 }
  0x21   :  { %p839_p1 = pnand %p838_p0, %p832_p11 }
  0x23   :  { %842 = shalt.err (!%p839_p1)
}
  0x24   :  { %s944_s10 = smov 128   ;;  %s945_s14 = smov 8  }
  0x25   :  { %67 = dma.hbm_to_vmem [thread:$0]  %s1119_s5, 2048, %s62_s24, [#allocation9], %s944_s10, %s944_s10, %s945_s14  }
  0x26   :  { %s843_s19 = scalar_lea.hbm %s1114_s0, 128 }
  0x27   :  { %p844_p2 = scmp.ne.s32.totalorder %s1114_s0, %s843_s19  ;;  %p847_p3 = scmp.lt.u32.totalorder %s843_s19, %s1114_s0 }
  0x29   :  { %p849_p4 = pnand %p847_p3, %p844_p2 }
  0x2b   :  { %852 = shalt.err (!%p849_p4)
}
  0x2c   :  { %s853_s25 = scalar_lea.vmem %s25_s26, 128  ;;  %p858_p6 = scmp.lt.s32.totalorder %s25_s26, %s25_s26 }
  0x2d   :  { %p854_p5 = scmp.ne.s32.totalorder %s25_s26, %s853_s25  ;;  %p859_p7 = scmp.lt.s32.totalorder %s853_s25, %s853_s25 }
  0x2f   :  { %p860_p8 = por %p859_p7, %p858_p6 }
  0x31   :  { %p861_p9 = pnand %p860_p8, %p854_p5 }
  0x33   :  { %864 = shalt.err (!%p861_p9)
}
  0x34   :  { %27 = dma.hbm_to_vmem [thread:$0]  %s1114_s0, 128, %s25_s26, [#allocation3]  }
  0x35   :  { %s946_s27 = smov [#allocation7]   ;;  %s947_s29 = smov [#allocation10]  }
  0x36   :  { %s47_s28 = sshll.u32 %s946_s27, 4  ;;  %s75_s30 = sshll.u32 %s947_s29, 4  ;;  %s48_s28 = int_to_ptr.vmem [resolvable:$true] %s47_s28  ;;  %s76_s30 = int_to_ptr.vmem [resolvable:$true] %s75_s30 }
  0x37   :  { %s865_s13 = scalar_lea.hbm %s1117_s3, 4096 }
  0x38   :  { %p866_p10 = scmp.ne.s32.totalorder %s1117_s3, %s865_s13  ;;  %p869_p11 = scmp.lt.u32.totalorder %s865_s13, %s1117_s3 }
  0x3a   :  { %p871_p12 = pnand %p869_p11, %p866_p10 }
  0x3c   :  { %874 = shalt.err (!%p871_p12)
}
  0x3d   :  { %s875_s0 = scalar_lea.vmem %s48_s28, 4096  ;;  %p880_p0 = scmp.lt.s32.totalorder %s48_s28, %s48_s28 }
  0x3e   :  { %p876_p13 = scmp.ne.s32.totalorder %s48_s28, %s875_s0  ;;  %p881_p1 = scmp.lt.s32.totalorder %s875_s0, %s875_s0 }
  0x40   :  { %p882_p2 = por %p881_p1, %p880_p0 }
  0x42   :  { %p883_p3 = pnand %p882_p2, %p876_p13 }
  0x44   :  { %886 = shalt.err (!%p883_p3)
}
  0x45   :  { %53 = dma.hbm_to_vmem [thread:$0]  %s1117_s3, 4096, %s48_s28, [#allocation6], %s944_s10, %s944_s10, %s945_s14  }
  0x46   :  { %s887_s21 = scalar_lea.hbm %s1121_s7, 2048 }
  0x47   :  { %p888_p4 = scmp.ne.s32.totalorder %s1121_s7, %s887_s21  ;;  %p891_p5 = scmp.lt.u32.totalorder %s887_s21, %s1121_s7 }
  0x49   :  { %p893_p6 = pnand %p891_p5, %p888_p4 }
  0x4b   :  { %896 = shalt.err (!%p893_p6)
}
  0x4c   :  { %s897_s24 = scalar_lea.vmem %s76_s30, 2048  ;;  %p902_p8 = scmp.lt.s32.totalorder %s76_s30, %s76_s30 }
  0x4d   :  { %p898_p7 = scmp.ne.s32.totalorder %s76_s30, %s897_s24  ;;  %p903_p9 = scmp.lt.s32.totalorder %s897_s24, %s897_s24 }
  0x4f   :  { %p904_p10 = por %p903_p9, %p902_p8 }
  0x51   :  { %p905_p11 = pnand %p904_p10, %p898_p7 }
  0x53   :  { %908 = shalt.err (!%p905_p11)
}
  0x54   :  { %81 = dma.hbm_to_vmem [thread:$0]  %s1121_s7, 2048, %s76_s30, [#allocation9], %s944_s10, %s944_s10, %s945_s14  }
  0x55   :  { %931 = dma.done.wait [#allocation3], 128  }
  0x56   :  { %932 = vsyncadd [#allocation3], 4294967168 }
  0x57   :  { %933 = dma.done.wait [#allocation6], 8192  }
  0x58   :  { %934 = vsyncadd [#allocation6], 4294959104 }
  0x59   :  { %935 = dma.done.wait [#allocation9], 4096  }
  0x5a   :  { %936 = vsyncadd [#allocation9], 4294963200  ;;  %v948_v0 = vmov 0.0   ;;  %v101_v1 = vld [vmem:[#allocation5 + $0x8] sm:$0xff]  ;;  %v103_v2 = vld [vmem:[#allocation5 + $0x18] sm:$0xff]  ;;  %vm950_vm0 = vmmov 0  }
  0x5b   :  { %208 = vmatprep.mubr.f32.mxu0 %v948_v0  ;;  %v100_v3 = vld [vmem:[#allocation5] sm:$0xff]  ;;  %v674_v4 = vpack.c.bf16 %v103_v2, %v101_v1  ;;  %v102_v5 = vld [vmem:[#allocation5 + $0x10] sm:$0xff]  ;;  %v105_v6 = vld [vmem:[#allocation5 + $0x28] sm:$0xff]  ;;  %s951_s11 = smov [#allocation11]  }
  0x5c   :  { %v107_v7 = vld [vmem:[#allocation5 + $0x38] sm:$0xff]  ;;  %v676_v8 = vpack.c.bf16 %v102_v5, %v100_v3  ;;  %v104_v10 = vld [vmem:[#allocation5 + $0x20] sm:$0xff]  ;;  %v106_v11 = vld [vmem:[#allocation5 + $0x30] sm:$0xff]  ;;  %s521_s12 = sshll.u32 %s951_s11, 4  ;;  %s522_s12 = int_to_ptr.vmem [resolvable:$true] %s521_s12 }
  0x5d   :  { %v678_v9 = vpack.c.bf16 %v107_v7, %v105_v6  ;;  %v109_v12 = vld [vmem:[#allocation5 + $0x48] sm:$0xff]  ;;  %675 = vmatprep.subr.bf16.mxu0 %v674_v4  ;;  %v111_v13 = vld [vmem:[#allocation5 + $0x58] sm:$0xff]  ;;  %v680_v14 = vpack.c.bf16 %v106_v11, %v104_v10  ;;  %v108_v16 = vld [vmem:[#allocation5 + $0x40] sm:$0xff]  ;;  %s909_s13 = scalar_lea.vmem %s522_s12, 128  ;;  %p914_p13 = scmp.lt.s32.totalorder %s522_s12, %s522_s12 }
  0x5e   :  { %677 = vmatpush1.bf16.msra.mxu0 %v676_v8  ;;  %v682_v15 = vpack.c.bf16 %v111_v13, %v109_v12  ;;  %v110_v17 = vld [vmem:[#allocation5 + $0x50] sm:$0xff]  ;;  %v113_v18 = vld [vmem:[#allocation5 + $0x68] sm:$0xff]  ;;  %v115_v19 = vld [vmem:[#allocation5 + $0x78] sm:$0xff]  ;;  %p910_p12 = scmp.ne.s32.totalorder %s522_s12, %s909_s13  ;;  %p915_p0 = scmp.lt.s32.totalorder %s909_s13, %s909_s13 }
  0x5f   :  { %679 = vmatprep.subr.bf16.mxu0 %v678_v9  ;;  %v684_v20 = vpack.c.bf16 %v110_v17, %v108_v16  ;;  %v686_v21 = vpack.c.bf16 %v115_v19, %v113_v18  ;;  %v112_v22 = vld [vmem:[#allocation5 + $0x60] sm:$0xff]  ;;  %v114_v23 = vld [vmem:[#allocation5 + $0x70] sm:$0xff]  ;;  %v117_v24 = vld [vmem:[#allocation5 + $0x88] sm:$0xff] }
  0x60   :  { %v119_v25 = vld [vmem:[#allocation5 + $0x98] sm:$0xff]  ;;  %v116_v26 = vld [vmem:[#allocation5 + $0x80] sm:$0xff]  ;;  %v118_v27 = vld [vmem:[#allocation5 + $0x90] sm:$0xff]  ;;  %v688_v31 = vpack.c.bf16 %v114_v23, %v112_v22  ;;  %p916_p1 = por %p915_p0, %p914_p13 }
  0x61   :  { %v233_v28 = vld [vmem:[#allocation7 + $0x80] sm:$0xff]  ;;  %v234_v29 = vld [vmem:[#allocation7 + $0x88] sm:$0xff]  ;;  %v235_v34 = vld [vmem:[#allocation7 + $0x90] sm:$0xff]  ;;  %v690_v36 = vpack.c.bf16 %v119_v25, %v117_v24  ;;  %v692_v46 = vpack.c.bf16 %v118_v27, %v116_v26 }
  0x62   :  { %681 = vmatpush1.bf16.msra.mxu0 %v680_v14  ;;  %v217_v30 = vld [vmem:[#allocation7] sm:$0xff]  ;;  %v706_v32 = vpack.c.bf16 %v234_v29, %v233_v28  ;;  %v218_v33 = vld [vmem:[#allocation7 + $0x8] sm:$0xff]  ;;  %v236_v35 = vld [vmem:[#allocation7 + $0x98] sm:$0xff]  ;;  %p917_p2 = pnand %p916_p1, %p910_p12 }
  0x63   :  { %683 = vmatprep.subr.bf16.mxu0 %v682_v15  ;;  %v708_v37 = vpack.c.bf16 %v218_v33, %v217_v30  ;;  %v710_v38 = vpack.c.bf16 %v236_v35, %v235_v34  ;;  %v219_v39 = vld [vmem:[#allocation7 + $0x10] sm:$0xff]  ;;  %v220_v40 = vld [vmem:[#allocation7 + $0x18] sm:$0xff]  ;;  %v237_v41 = vld [vmem:[#allocation7 + $0xa0] sm:$0xff] }
  0x64   :  { %v121_v42 = vld [vmem:[#allocation5 + $0xa8] sm:$0xff]  ;;  %v123_v43 = vld [vmem:[#allocation5 + $0xb8] sm:$0xff]  ;;  %707 = vmatprep.subr.bf16.mxu1 %v706_v32  ;;  %v712_v45 = vpack.c.bf16 %v220_v40, %v219_v39  ;;  %v120_v47 = vld [vmem:[#allocation5 + $0xa0] sm:$0xff] }
  0x65   :  { %v238_v44 = vld [vmem:[#allocation7 + $0xa8] sm:$0xff]  ;;  %709 = vmatpush3.bf16.msra.mxu1 %v708_v37  ;;  %v221_v49 = vld [vmem:[#allocation7 + $0x20] sm:$0xff]  ;;  %v694_v51 = vpack.c.bf16 %v123_v43, %v121_v42  ;;  %v122_v52 = vld [vmem:[#allocation5 + $0xb0] sm:$0xff] }
  0x66   :  { %685 = vmatpush1.bf16.msra.mxu0 %v684_v20  ;;  %711 = vmatprep.subr.bf16.mxu1 %v710_v38  ;;  %v714_v48 = vpack.c.bf16 %v238_v44, %v237_v41  ;;  %v222_v50 = vld [vmem:[#allocation7 + $0x28] sm:$0xff]  ;;  %v239_v53 = vld [vmem:[#allocation7 + $0xb0] sm:$0xff]  ;;  %v240_v54 = vld [vmem:[#allocation7 + $0xb8] sm:$0xff]  ;;  %v696_v58 = vpack.c.bf16 %v122_v52, %v120_v47  ;;  %v949_v38 = vmov 0.0|0.0  }
  0x67   :  { %687 = vmatprep.subr.bf16.mxu0 %v686_v21  ;;  %v125_v55 = vld [vmem:[#allocation5 + $0xc8] sm:$0xff]  ;;  %v127_v56 = vld [vmem:[#allocation5 + $0xd8] sm:$0xff]  ;;  %v716_v57 = vpack.c.bf16 %v222_v50, %v221_v49  ;;  %v124_v59 = vld [vmem:[#allocation5 + $0xc0] sm:$0xff]  ;;  %v718_v60 = vpack.c.bf16 %v240_v54, %v239_v53  ;;  %v134_v54 = vlaneseq }
  0x68   :  { %v223_v61 = vld [vmem:[#allocation7 + $0x30] sm:$0xff]  ;;  %v224_v62 = vld [vmem:[#allocation7 + $0x38] sm:$0xff]  ;;  %v698_v63 = vpack.c.bf16 %v127_v56, %v125_v55  ;;  %v241_v2 = vld [vmem:[#allocation7 + $0xc0] sm:$0xff] }
  0x69   :  { %713 = vmatpush3.bf16.msra.mxu1 %v712_v45  ;;  %v126_v1 = vld [vmem:[#allocation5 + $0xd0] sm:$0xff]  ;;  %v242_v3 = vld [vmem:[#allocation7 + $0xc8] sm:$0xff]  ;;  %v131_v5 = vld [vmem:[#allocation5 + $0xf8] sm:$0xff]  ;;  %v720_v6 = vpack.c.bf16 %v224_v62, %v223_v61  ;;  %v135_v55 = vshrl.u32 %v134_v54, 7 }
  0x6a   :  { %689 = vmatpush1.bf16.msra.mxu0 %v688_v31  ;;  %715 = vmatprep.subr.bf16.mxu1 %v714_v48  ;;  %v129_v4 = vld [vmem:[#allocation5 + $0xe8] sm:$0xff]  ;;  %v700_v7 = vpack.c.bf16 %v126_v1, %v124_v59  ;;  %v128_v8 = vld [vmem:[#allocation5 + $0xe0] sm:$0xff]  ;;  %v722_v9 = vpack.c.bf16 %v242_v3, %v241_v2  ;;  %v130_v13 = vld [vmem:[#allocation5 + $0xf0] sm:$0xff] }
  0x6b   :  { %691 = vmatprep.subr.bf16.mxu0 %v690_v36  ;;  %v225_v10 = vld [vmem:[#allocation7 + $0x40] sm:$0xff]  ;;  %v226_v11 = vld [vmem:[#allocation7 + $0x48] sm:$0xff]  ;;  %v702_v12 = vpack.c.bf16 %v131_v5, %v129_v4  ;;  %v243_v14 = vld [vmem:[#allocation7 + $0xd0] sm:$0xff]  ;;  %v704_v17 = vpack.c.bf16 %v130_v13, %v128_v8  ;;  %v136_v56 = vsub.s32 0, %v135_v55 }
  0x6c   :  { %v244_v15 = vld [vmem:[#allocation7 + $0xd8] sm:$0xff]  ;;  %v724_v16 = vpack.c.bf16 %v226_v11, %v225_v10  ;;  %v227_v19 = vld [vmem:[#allocation7 + $0x50] sm:$0xff]  ;;  %v245_v21 = vld [vmem:[#allocation7 + $0xe0] sm:$0xff] }
  0x6d   :  { %717 = vmatpush3.bf16.msra.mxu1 %v716_v57  ;;  %v726_v18 = vpack.c.bf16 %v244_v15, %v243_v14  ;;  %v228_v20 = vld [vmem:[#allocation7 + $0x58] sm:$0xff]  ;;  %v246_v22 = vld [vmem:[#allocation7 + $0xe8] sm:$0xff]  ;;  %v229_v26 = vld [vmem:[#allocation7 + $0x60] sm:$0xff] }
  0x6e   :  { %693 = vmatpush1.bf16.msra.mxu0 %v692_v46  ;;  %719 = vmatprep.subr.bf16.mxu1 %v718_v60  ;;  %v728_v23 = vpack.c.bf16 %v228_v20, %v227_v19  ;;  %v99_v24 = vld [vmem:[#allocation2] sm:$0xff]  ;;  %v730_v25 = vpack.c.bf16 %v246_v22, %v245_v21  ;;  %v230_v27 = vld [vmem:[#allocation7 + $0x68] sm:$0xff]  ;;  %v247_v29 = vld [vmem:[#allocation7 + $0xf0] sm:$0xff] }
  0x6f   :  { %695 = vmatprep.subr.bf16.mxu0 %v694_v51  ;;  %v732_v28 = vpack.c.bf16 %v230_v27, %v229_v26  ;;  %v248_v30 = vld [vmem:[#allocation7 + $0xf8] sm:$0xff]  ;;  %v231_v32 = vld [vmem:[#allocation7 + $0x70] sm:$0xff]  ;;  %v327_v35 = vld [vmem:[#allocation8] sm:$0xff] }
  0x70   :  { %v734_v31 = vpack.c.bf16 %v248_v30, %v247_v29  ;;  %v232_v33 = vld [vmem:[#allocation7 + $0x78] sm:$0xff]  ;;  %v328_v36 = vld [vmem:[#allocation8 + $0x8] sm:$0xff]  ;;  %v329_v37 = vld [vmem:[#allocation8 + $0x10] sm:$0xff] }
  0x71   :  { %721 = vmatpush3.bf16.msra.mxu1 %v720_v6  ;;  %v736_v34 = vpack.c.bf16 %v232_v33, %v231_v32  ;;  %v739_v39 = vpack.c.bf16 %v328_v36, %v327_v35  ;;  %v330_v40 = vld [vmem:[#allocation8 + $0x18] sm:$0xff]  ;;  %v331_v42 = vld [vmem:[#allocation8 + $0x20] sm:$0xff]  ;;  %v332_v43 = vld [vmem:[#allocation8 + $0x28] sm:$0xff] }
  0x72   :  { %697 = vmatpush1.bf16.msra.mxu0 %v696_v58  ;;  %723 = vmatprep.subr.bf16.mxu1 %v722_v9  ;;  %v742_v41 = vpack.c.bf16 %v330_v40, %v329_v37  ;;  %v745_v44 = vpack.c.bf16 %v332_v43, %v331_v42  ;;  %v333_v45 = vld [vmem:[#allocation8 + $0x30] sm:$0xff]  ;;  %v334_v46 = vld [vmem:[#allocation8 + $0x38] sm:$0xff]  ;;  %v335_v48 = vld [vmem:[#allocation8 + $0x40] sm:$0xff]  ;;  %v140_v58 = vsub.s32 1, %v135_v55 }
  0x73   :  { %699 = vmatprep.subr.bf16.mxu0 %v698_v63  ;;  %v748_v47 = vpack.c.bf16 %v334_v46, %v333_v45  ;;  %v336_v49 = vld [vmem:[#allocation8 + $0x48] sm:$0xff]  ;;  %v337_v51 = vld [vmem:[#allocation8 + $0x50] sm:$0xff]  ;;  %v338_v52 = vld [vmem:[#allocation8 + $0x58] sm:$0xff] }
  0x74   :  { %v751_v50 = vpack.c.bf16 %v336_v49, %v335_v48  ;;  %v754_v53 = vpack.c.bf16 %v338_v52, %v337_v51  ;;  %v132_v57 = vld [vmem:[%s1116_s2] sm:$0x3]  ;;  %v339_v4 = vld [vmem:[#allocation8 + $0x60] sm:$0xff]  ;;  %v340_v5 = vld [vmem:[#allocation8 + $0x68] sm:$0xff] }
  0x75   :  { %725 = vmatpush3.bf16.msra.mxu1 %v724_v16  ;;  %v137_v59 = vrot.slane %v132_v57, %v136_v56  ;;  %v141_v60 = vrot.slane %v132_v57, %v140_v58  ;;  %v757_v6 = vpack.c.bf16 %v340_v5, %v339_v4  ;;  %v342_v8 = vld [vmem:[#allocation8 + $0x78] sm:$0xff]  ;;  %v421_v10 = vld [vmem:[#allocation10] sm:$0xff]  ;;  %v422_v11 = vld [vmem:[#allocation10 + $0x8] sm:$0xff] }
  0x76   :  { %701 = vmatpush1.bf16.msra.mxu0 %v700_v7  ;;  %727 = vmatprep.subr.bf16.mxu1 %v726_v18  ;;  %v341_v7 = vld [vmem:[#allocation8 + $0x70] sm:$0xff]  ;;  %v763_v13 = vpack.c.bf16 %v422_v11, %v421_v10  ;;  %v424_v14 = vld [vmem:[#allocation10 + $0x18] sm:$0xff]  ;;  %v425_v16 = vld [vmem:[#allocation10 + $0x20] sm:$0xff] }
  0x77   :  { %703 = vmatprep.subr.bf16.mxu0 %v702_v12  ;;  %v760_v9 = vpack.c.bf16 %v342_v8, %v341_v7  ;;  %v423_v12 = vld [vmem:[#allocation10 + $0x10] sm:$0xff]  ;;  %v428_v20 = vld [vmem:[#allocation10 + $0x38] sm:$0xff]  ;;  %v430_v22 = vld [vmem:[#allocation10 + $0x48] sm:$0xff] }
  0x78   :  { %v766_v15 = vpack.c.bf16 %v424_v14, %v423_v12  ;;  %v427_v19 = vld [vmem:[#allocation10 + $0x30] sm:$0xff]  ;;  %v433_v27 = vld [vmem:[#allocation10 + $0x60] sm:$0xff]  ;;  %v436_v37 = vld [vmem:[#allocation10 + $0x78] sm:$0xff] }
  0x79   :  { %729 = vmatpush3.bf16.msra.mxu1 %v728_v23  ;;  %v772_v21 = vpack.c.bf16 %v428_v20, %v427_v19  ;;  %v435_v36 = vld [vmem:[#allocation10 + $0x70] sm:$0xff]  ;;  %v533_v40 = vld [vmem:[%s1120_s6] ss:$0 sm:$0xff] }
  0x7a   :  { %705 = vmatpush1.bf16.msra.mxu0 %v704_v17  ;;  %731 = vmatprep.subr.bf16.mxu1 %v730_v25  ;;  %v426_v17 = vld [vmem:[#allocation10 + $0x28] sm:$0xff]  ;;  %v432_v25 = vld [vmem:[#allocation10 + $0x58] sm:$0xff] }
  0x7b   :  { %738 = vmatprep.subr.bf16.mxu0 %v949_v38  ;;  %v769_v18 = vpack.c.bf16 %v426_v17, %v425_v16 }
  0x7d   :  { %209 = vmatmul.mubr.f32.vlgmr.msra.gmra.mrb[0].mxu0 %v99_v24  ;;  %733 = vmatpush3.bf16.msra.mxu1 %v732_v28  ;;  %v431_v24 = vld [vmem:[#allocation10 + $0x50] sm:$0xff]  ;;  %v434_v28 = vld [vmem:[#allocation10 + $0x68] sm:$0xff] }
  0x7e   :  { %735 = vmatprep.subr.bf16.mxu1 %v734_v31  ;;  %740 = vmatpush3.bf16.msra.mxu0 %v739_v39  ;;  %v778_v26 = vpack.c.bf16 %v432_v25, %v431_v24  ;;  %v781_v29 = vpack.c.bf16 %v434_v28, %v433_v27  ;;  %v532_v31 = vld [vmem:[%s1118_s4] ss:$0 sm:$0xff]  ;;  %v784_v39 = vpack.c.bf16 %v436_v37, %v435_v36 }
  0x7f   :  { %741 = vmatprep.subr.bf16.mxu0 %v949_v38  ;;  %636 = vmatprep.mubr.msk.f32.mxu0 %vm950_vm0, %v948_v0 }
  0x81   :  { %737 = vmatpush3.bf16.msra.mxu1 %v736_v34 }
  0x82   :  { %762 = vmatprep.subr.bf16.mxu1 %v949_v38  ;;  %743 = vmatpush3.bf16.msra.mxu0 %v742_v41 }
  0x83   :  { %744 = vmatprep.subr.bf16.mxu0 %v949_v38 }
  0x86   :  { %746 = vmatpush3.bf16.msra.mxu0 %v745_v44  ;;  %v534_v44 = vld [vmem:[%s1122_s8] ss:$0 sm:$0xff] }
  0x87   :  { %747 = vmatprep.subr.bf16.mxu0 %v949_v38 }
  0x8a   :  { %749 = vmatpush3.bf16.msra.mxu0 %v748_v47 }
  0x8b   :  { %750 = vmatprep.subr.bf16.mxu0 %v949_v38 }
  0x8e   :  { %752 = vmatpush3.bf16.msra.mxu0 %v751_v50 }
  0x8f   :  { %753 = vmatprep.subr.bf16.mxu0 %v949_v38 }
  0x92   :  { %755 = vmatpush3.bf16.msra.mxu0 %v754_v53 }
  0x93   :  { %756 = vmatprep.subr.bf16.mxu0 %v949_v38 }
  0x96   :  { %758 = vmatpush3.bf16.msra.mxu0 %v757_v6 }
  0x97   :  { %759 = vmatprep.subr.bf16.mxu0 %v949_v38 }
  0x9a   :  { %761 = vmatpush3.bf16.msra.mxu0 %v760_v9 }
 0x150   :  { %v210_v61 = vpop.f32.mrb[0].mxu0 }
 0x151   :  { %v211_v62 = vadd.f32 %v210_v61, %v137_v59  ;;  %v212_v63 = vpop.f32.mrb[1].mxu0 }
 0x152   :  { %v213_v1 = vadd.f32 %v212_v63, %v141_v60 }
 0x153   :  { %v215_v3 = vmax.f32 %v211_v62, 0.0 }
 0x154   :  { %v216_v2 = vmax.f32 %v213_v1, 0.0 }
 0x156   :  { %320 = vmatprep.mubr.f32.mxu1 %v216_v2 }
 0x157   :  { %321 = vmatmul.mubr.f32.vlgmr.msra.gmra.mrb[0].mxu1 %v215_v3 }
 0x158   :  { %671 = vmatprep.mubr.msk.f32.mxu1 %vm950_vm0, %v948_v0  ;;  %764 = vmatpush3.bf16.msra.mxu1 %v763_v13  ;;  %v429_v0 = vld [vmem:[#allocation10 + $0x40] sm:$0xff] }
 0x159   :  { %765 = vmatprep.subr.bf16.mxu1 %v949_v38  ;;  %v775_v23 = vpack.c.bf16 %v430_v22, %v429_v0 }
 0x15c   :  { %767 = vmatpush3.bf16.msra.mxu1 %v766_v15 }
 0x15d   :  { %768 = vmatprep.subr.bf16.mxu1 %v949_v38 }
 0x160   :  { %770 = vmatpush3.bf16.msra.mxu1 %v769_v18 }
 0x161   :  { %771 = vmatprep.subr.bf16.mxu1 %v949_v38 }
 0x164   :  { %773 = vmatpush3.bf16.msra.mxu1 %v772_v21 }
 0x165   :  { %774 = vmatprep.subr.bf16.mxu1 %v949_v38 }
 0x168   :  { %776 = vmatpush3.bf16.msra.mxu1 %v775_v23 }
 0x169   :  { %777 = vmatprep.subr.bf16.mxu1 %v949_v38 }
 0x16c   :  { %779 = vmatpush3.bf16.msra.mxu1 %v778_v26 }
 0x16d   :  { %780 = vmatprep.subr.bf16.mxu1 %v949_v38 }
 0x170   :  { %782 = vmatpush3.bf16.msra.mxu1 %v781_v29 }
 0x171   :  { %783 = vmatprep.subr.bf16.mxu1 %v949_v38 }
 0x174   :  { %785 = vmatpush3.bf16.msra.mxu1 %v784_v39 }
 0x22a   :  { %v567_v30 = vpop.f32.mrb[0].mxu1 }
 0x22b   :  { %v568_v32 = vpop.f32.mrb[1].mxu1 }
 0x22c   :  { %v569_v33 = vadd.f32 %v568_v32, %v567_v30 }
 0x22e   :  { %v323_v34 = vadd.f32 %v569_v33, %v532_v31 }
 0x230   :  { %v326_v35 = vmax.f32 %v323_v34, 0.0 }
 0x232   :  { %637 = vmatmul.mubr.f32.vlgmr.msra.gmra.mrb[2].mxu0 %v326_v35 }
 0x305   :  { %v416_v41 = vpop.f32.mrb[2].mxu0 }
 0x306   :  { %v417_v38 = vadd.f32 %v533_v40, %v416_v41  ;;  %v638_v42 = vpop.f32.mrb[3].mxu0 }
 0x308   :  { %v420_v43 = vmax.f32 %v417_v38, 0.0 }
 0x30a   :  { %672 = vmatmul.mubr.f32.vlgmr.msra.gmra.mrb[2].mxu1 %v420_v43 }
 0x3dd   :  { %v510_v45 = vpop.f32.mrb[2].mxu1 }
 0x3de   :  { %v511_v46 = vadd.f32 %v534_v44, %v510_v45  ;;  %v673_v47 = vpop.f32.mrb[3].mxu1 }
 0x3e0   :  { %514 = vst [vmem:[#allocation11] sm:$0xff] %v511_v46 }
 0x3e1   :  { %920 = shalt.err (!%p917_p2)
}
 0x3e2   :  { %s921_s15 = scalar_lea.hbm %s1123_s9, 128 }
 0x3e3   :  { %p922_p3 = scmp.ne.s32.totalorder %s1123_s9, %s921_s15  ;;  %p925_p4 = scmp.lt.u32.totalorder %s921_s15, %s1123_s9 }
 0x3e5   :  { %p927_p5 = pnand %p925_p4, %p922_p3 }
 0x3e7   :  { %930 = shalt.err (!%p927_p5)
}
 0x3e8   :  { %524 = dma.vmem_to_hbm [thread:$0]  %s522_s12, 128, %s1123_s9, [#allocation4]  }
 0x3e9   :  { %937 = dma.done.wait [#allocation4], 128  }
 0x3ea   :  { %938 = vsyncadd [#allocation4], 4294967168 }
 0x3eb   :  { %528 = vsyncpa [#allocation3], 1 }
 0x3ec   :  { %529 = vsyncpa [#allocation6], 1 }
 0x3ed   :  { %530 = vsyncpa [#allocation9], 1 }
 0x3ee   :  { %531 = vsyncpa [#allocation4], 1 }

</bundles_post_ra>
